<compile_context>
chip_gen: v6e
topology: v6e:2x2x1
jax: 0.10.0
libtpu: 0.0.40
codegen_flags: <defaults>
</compile_context>

<pallas_src>
import functools

import jax
import jax.numpy as jnp
from jax import lax
from jax.experimental import pallas as pl
from jax.experimental.pallas import tpu as pltpu

EPS = 1e-6


def _round_up(x, m):
    return ((x + m - 1) // m) * m


def _nafblock_kernel(H, W, C, PAD, BS,
                     x_ref, col_ref,
                     w1, w2, wsca, w3, w4, w5, bcat,
                     out_ref,
                     pad_scr):
    """One grid step == one batch element.  x_ref block: (1, C, H*W) float32."""
    HW = H * W
    C2 = 2 * C

    inp = x_ref[0]                                            # (C, HW)

    def bias(slot, rows):
        # 8-aligned static offsets into the concatenated bias array.
        return bcat[slot * BS:slot * BS + rows, :]

    b1, b2, bsca = bias(0, C2), bias(1, C2), bias(2, C)
    b3, b4, b5 = bias(3, C), bias(4, C2), bias(5, C)

    def layer_norm(x):
        # LayerNorm2d; the affine part is folded into the following 1x1 conv.
        mu = jnp.mean(x, axis=0, keepdims=True)               # (1, HW)
        d = x - mu
        var = jnp.mean(d * d, axis=0, keepdims=True)          # (1, HW)
        return d * lax.rsqrt(var + EPS)

    # ---- branch 1: norm1 -> conv1 -> dwconv3x3 -> SimpleGate -> SCA -> conv3 ----
    t = jnp.dot(w1[...], layer_norm(inp),
                preferred_element_type=jnp.float32) + b1      # (C2, HW)

    # Depthwise 3x3, padding=1.  Stage t once into the zero-padded scratch so
    # the dh = +-1 row taps see zeros above/below the image; dw = +-1 taps are
    # pltpu.roll's of the three row taps, with row-wrap lanes masked.  Borders
    # are re-zeroed every step (two lane-tile stores, negligible) so
    # correctness never depends on scratch persistence if the batch axis is
    # core-sharded.
    pad_scr[:, :PAD] = jnp.zeros((C2, PAD), jnp.float32)
    pad_scr[:, PAD + HW:] = jnp.zeros((C2, PAD), jnp.float32)
    pad_scr[:, PAD:PAD + HW] = t

    # For production W % 128 == 0 these two loads are lane-aligned (PAD is a
    # multiple of 128); at the tiny test W = 16 they are merely misaligned.
    up = pad_scr[:, PAD - W:PAD - W + HW]                     # value at (h-1, w)
    dn = pad_scr[:, PAD + W:PAD + W + HW]                     # value at (h+1, w)

    ww = col_ref[...]                                         # (1, HW) int32: w index
    ok_left = ww >= 1                                         # dw = -1 stays in-row
    ok_right = ww <= (W - 2)                                  # dw = +1 stays in-row

    w2v = w2[...]                                             # (C2, 9), k = kh*3 + kw
    # dw = 0 column: accumulator seeded with the live centre tap (no load).
    acc = t * w2v[:, 4:5] + up * w2v[:, 1:2] + dn * w2v[:, 7:8]
    # dw = -1 column (k = 0, 3, 6): rotate towards higher index by 1.
    part_l = (pltpu.roll(up, 1, 1) * w2v[:, 0:1]
              + pltpu.roll(t, 1, 1) * w2v[:, 3:4]
              + pltpu.roll(dn, 1, 1) * w2v[:, 6:7])
    # dw = +1 column (k = 2, 5, 8): rotate by HW-1 (== -1 mod HW).
    part_r = (pltpu.roll(up, HW - 1, 1) * w2v[:, 2:3]
              + pltpu.roll(t, HW - 1, 1) * w2v[:, 5:6]
              + pltpu.roll(dn, HW - 1, 1) * w2v[:, 8:9])
    t = (acc + jnp.where(ok_left, part_l, 0.0)
         + jnp.where(ok_right, part_r, 0.0) + b2)             # (C2, HW)

    # SimpleGate.  (For C % 8 != 0 this sublane split costs one XLU shuffle on
    # a (C2, HW) value; production C >= 32 is clean.)
    g = t[:C, :] * t[C:, :]                                   # (C, HW)

    # Simplified Channel Attention: global average pool + 1x1 conv, then scale.
    pooled = jnp.sum(g, axis=1, keepdims=True) * (1.0 / HW)   # (C, 1)
    sca = jnp.dot(wsca[...], pooled, preferred_element_type=jnp.float32) + bsca
    g = g * sca

    # conv3 with beta folded into (w3, b3): y = inp + conv3(g).
    y = inp + jnp.dot(w3[...], g, preferred_element_type=jnp.float32) + b3

    # ---- branch 2: norm2 -> conv4 -> SimpleGate -> conv5 (gamma folded) ---------
    t = jnp.dot(w4[...], layer_norm(y),
                preferred_element_type=jnp.float32) + b4      # (C2, HW)
    g = t[:C, :] * t[C:, :]                                   # (C, HW)
    out_ref[0] = y + jnp.dot(w5[...], g, preferred_element_type=jnp.float32) + b5


def _vmem_limit_bytes():
    # Per-generation scoped-VMEM cap (~0.75x physical), leaving headroom for
    # Mosaic internal scratch + double-buffered inputs:
    #   v7x (64 MiB / TC) -> 48 MiB;  v5e / v6e (128 MiB) -> 96 MiB.
    try:
        cap = int(pltpu.get_tpu_info().vmem_capacity_bytes)
        return min((cap * 3) // 4, 112 * 1024 * 1024)
    except Exception:
        return 48 * 1024 * 1024                     # safe on every generation


def _fold_params(p):
    """Fold LayerNorm affines and the beta/gamma residual scales into the
    adjacent 1x1 conv weights (host-side precompute, free)."""
    w1 = p['w1'] * p['ln1_w'].reshape(1, -1)        # scale conv1 columns by ln1_w
    b1 = p['b1'] + p['w1'] @ p['ln1_b']
    w4 = p['w4'] * p['ln2_w'].reshape(1, -1)        # scale conv4 columns by ln2_w
    b4 = p['b4'] + p['w4'] @ p['ln2_b']
    w3 = p['w3'] * p['beta']                        # scale conv3 rows by beta
    b3 = p['b3'] * p['beta']
    w5 = p['w5'] * p['gamma']                       # scale conv5 rows by gamma
    b5 = p['b5'] * p['gamma']
    return w1, b1, p['w2'], p['b2'], p['wsca'], p['bsca'], w3, b3, w4, b4, w5, b5


def nafblock_pallas(x_nchw, params):
    N, C, H, W = x_nchw.shape
    HW = H * W
    C2 = 2 * C
    PAD = _round_up(W, 128)             # lane-aligned zero halo (>= one image row)
    BS = _round_up(C2, 8)               # 8-aligned slot size for the bias concat

    w1, b1, w2, b2, wsca, bsca, w3, b3, w4, b4, w5, b5 = _fold_params(params)

    def slot(b):
        return jnp.pad(b, ((0, BS - b.shape[0]), (0, 0)))

    bcat = jnp.concatenate(
        [slot(b1), slot(b2), slot(bsca), slot(b3), slot(b4), slot(b5)], axis=0)

    # NCHW -> (N, C, H*W): channels on sublanes, flattened spatial on lanes.
    x = x_nchw.reshape(N, C, HW)
    # Column index of every flattened spatial position (dw = +-1 wrap masks).
    col_idx = (jnp.arange(HW, dtype=jnp.int32) % W).reshape(1, HW)

    big = [w1, w2, wsca, w3, w4, w5, bcat]          # all 2D, constant per step

    in_specs = [pl.BlockSpec((1, C, HW), lambda n: (n, 0, 0)),
                pl.BlockSpec((1, HW), lambda n: (0, 0))]
    in_specs += [pl.BlockSpec(w.shape, lambda n: (0, 0)) for w in big]

    out = pl.pallas_call(
        functools.partial(_nafblock_kernel, H, W, C, PAD, BS),
        out_shape=jax.ShapeDtypeStruct((N, C, HW), jnp.float32),
        grid_spec=pltpu.PrefetchScalarGridSpec(
            num_scalar_prefetch=0,
            grid=(N,),
            in_specs=in_specs,
            out_specs=pl.BlockSpec((1, C, HW), lambda n: (n, 0, 0)),
            scratch_shapes=[
                pltpu.VMEM((C2, 2 * PAD + HW), jnp.float32),   # padded dwconv stage
            ],
        ),
        compiler_params=pltpu.CompilerParams(
            dimension_semantics=("parallel",),
            vmem_limit_bytes=_vmem_limit_bytes(),
        ),
    )(x, col_idx, *big)

    # TODO(synk): for production sizes (e.g. 256x256x32) add a row-strip grid
    # axis (strips of ~64-96 rows, 1-row halo recomputed through LN+conv1) so
    # the per-step footprint fits v7x's 64 MiB VMEM and the pipeline / both TCs
    # get enough steps; the SCA global pool then needs a pool-then-apply
    # two-pass split of branch 1.  On v6e/v7x additionally run the dwconv/gate
    # and matmul operands in bf16 (f32 accumulation); keep f32 on v5e.
    return out.reshape(N, C, H, W)


def init_params(key, c):
    """Deterministic synthetic parameters with NAFBlock.__init__ shapes, stored
    in the kernel's channel-on-sublane layout: 1x1 conv weights as (Cout, Cin),
    per-channel vectors as (C, 1) columns, depthwise 3x3 weights as (2c, 9)
    with tap index k = kh*3 + kw.

    NOTE: the PyTorch module initializes LayerNorm weight=1/bias=0 and
    beta=gamma=0 (which would make the block an identity); random values are
    used here so the kernel path is actually exercised.
    """
    c2 = 2 * c          # dw_channel
    cf = 2 * c          # ffn_channel
    ks = jax.random.split(key, 18)

    def rnd(k, shape, scale=0.2):
        return jax.random.normal(k, shape, jnp.float32) * scale

    return {
        'ln1_w': rnd(ks[0], (c, 1)) + 1.0,
        'ln1_b': rnd(ks[1], (c, 1), 0.05),
        'w1':    rnd(ks[2], (c2, c)),          # conv1 1x1: c -> 2c   (Cout, Cin)
        'b1':    rnd(ks[3], (c2, 1), 0.05),
        'w2':    rnd(ks[4], (c2, 9)),          # depthwise 3x3: (channel, kh*3+kw)
        'b2':    rnd(ks[5], (c2, 1), 0.05),
        'wsca':  rnd(ks[6], (c, c)),           # SCA 1x1: c -> c
        'bsca':  rnd(ks[7], (c, 1), 0.05),
        'w3':    rnd(ks[8], (c, c)),           # conv3 1x1: c -> c
        'b3':    rnd(ks[9], (c, 1), 0.05),
        'beta':  rnd(ks[10], (c, 1)),
        'ln2_w': rnd(ks[11], (c, 1)) + 1.0,
        'ln2_b': rnd(ks[12], (c, 1), 0.05),
        'w4':    rnd(ks[13], (cf, c)),         # conv4 1x1: c -> 2c
        'b4':    rnd(ks[14], (cf, 1), 0.05),
        'w5':    rnd(ks[15], (c, cf // 2)),    # conv5 1x1: c -> c
        'b5':    rnd(ks[16], (c, 1), 0.05),
        'gamma': rnd(ks[17], (c, 1)),
    }


def nafblock_reference(x, p):
    """Pure-JAX reference matching the PyTorch forward semantics (NCHW)."""
    hi = lax.Precision.HIGHEST
    N, C, H, W = x.shape

    def ln(v, w, b):
        mu = v.mean(axis=1, keepdims=True)
        var = ((v - mu) ** 2).mean(axis=1, keepdims=True)
        return ((v - mu) / jnp.sqrt(var + EPS) * w.reshape(1, -1, 1, 1)
                + b.reshape(1, -1, 1, 1))

    def conv1x1(v, w, b):
        return jnp.einsum('oc,nchw->nohw', w, v, precision=hi) + b.reshape(1, -1, 1, 1)

    inp = x
    t = ln(inp, p['ln1_w'], p['ln1_b'])
    t = conv1x1(t, p['w1'], p['b1'])
    tp = jnp.pad(t, ((0, 0), (0, 0), (1, 1), (1, 1)))
    acc = jnp.zeros_like(t)
    for kh in range(3):
        for kw in range(3):
            wk = p['w2'][:, kh * 3 + kw].reshape(1, -1, 1, 1)
            acc = acc + tp[:, :, kh:kh + H, kw:kw + W] * wk
    t = acc + p['b2'].reshape(1, -1, 1, 1)
    c2 = t.shape[1]
    t = t[:, :c2 // 2] * t[:, c2 // 2:]
    pooled = t.mean(axis=(2, 3), keepdims=True)
    sca = (jnp.einsum('oc,nchw->nohw', p['wsca'], pooled, precision=hi)
           + p['bsca'].reshape(1, -1, 1, 1))
    t = t * sca
    t = conv1x1(t, p['w3'], p['b3'])
    y = inp + t * p['beta'].reshape(1, -1, 1, 1)
    t = ln(y, p['ln2_w'], p['ln2_b'])
    t = conv1x1(t, p['w4'], p['b4'])
    cf = t.shape[1]
    t = t[:, :cf // 2] * t[:, cf // 2:]
    t = conv1x1(t, p['w5'], p['b5'])
    return y + t * p['gamma'].reshape(1, -1, 1, 1)


if __name__ == "__main__":
    key = jax.random.PRNGKey(0)
    kx, kp = jax.random.split(key)

    N, C, H, W = 2, 4, 16, 16
    x = jax.random.normal(kx, (N, C, H, W), jnp.float32)
    params = init_params(kp, C)

    out = nafblock_pallas(x, params)
    out = jax.block_until_ready(out)

    ref = nafblock_reference(x, params)
    assert out.shape == x.shape
    err = float(jnp.max(jnp.abs(out - ref)))
    assert jnp.allclose(out, ref, atol=1e-2, rtol=1e-2), f"max abs err = {err}"
    print("KERNEL_OK")
</pallas_src>

<mosaic_0001>
module attributes {stable_mosaic.version = 11 : i64} {
  func.func @_nafblock_kernel(%arg0: i32, %arg1: memref<1x4x256xf32, #tpu.memory_space<vmem>>, %arg2: memref<1x256xi32, #tpu.memory_space<vmem>>, %arg3: memref<8x4xf32, #tpu.memory_space<vmem>>, %arg4: memref<8x9xf32, #tpu.memory_space<vmem>>, %arg5: memref<4x4xf32, #tpu.memory_space<vmem>>, %arg6: memref<4x4xf32, #tpu.memory_space<vmem>>, %arg7: memref<8x4xf32, #tpu.memory_space<vmem>>, %arg8: memref<4x4xf32, #tpu.memory_space<vmem>>, %arg9: memref<48x1xf32, #tpu.memory_space<vmem>>, %arg10: memref<1x4x256xf32, #tpu.memory_space<vmem>>, %arg11: memref<8x512xf32, #tpu.memory_space<vmem>>) attributes {dimension_semantics = [#tpu.dimension_semantics<parallel>], iteration_bounds = array<i64: 2>, scalar_prefetch = 0 : i64, scratch_operands = 1 : i64, tpu.core_type = #tpu.core_type<tc>, window_params = [{transform_indices = @transform_0, window_bounds = array<i64: 1, 4, 256>}, {pipeline_mode = #tpu.pipeline_mode<synchronous>, transform_indices = @transform_1, window_bounds = array<i64: 1, 256>}, {pipeline_mode = #tpu.pipeline_mode<synchronous>, transform_indices = @transform_2, window_bounds = array<i64: 8, 4>}, {pipeline_mode = #tpu.pipeline_mode<synchronous>, transform_indices = @transform_3, window_bounds = array<i64: 8, 9>}, {pipeline_mode = #tpu.pipeline_mode<synchronous>, transform_indices = @transform_4, window_bounds = array<i64: 4, 4>}, {pipeline_mode = #tpu.pipeline_mode<synchronous>, transform_indices = @transform_5, window_bounds = array<i64: 4, 4>}, {pipeline_mode = #tpu.pipeline_mode<synchronous>, transform_indices = @transform_6, window_bounds = array<i64: 8, 4>}, {pipeline_mode = #tpu.pipeline_mode<synchronous>, transform_indices = @transform_7, window_bounds = array<i64: 4, 4>}, {pipeline_mode = #tpu.pipeline_mode<synchronous>, transform_indices = @transform_8, window_bounds = array<i64: 48, 1>}, {transform_indices = @transform_9, window_bounds = array<i64: 1, 4, 256>}]} {
    %c0 = arith.constant 0 : index
    %c0_0 = arith.constant 0 : index
    %c0_1 = arith.constant 0 : index
    %0 = vector.load %arg1[%c0, %c0_0, %c0_1] : memref<1x4x256xf32, #tpu.memory_space<vmem>>, vector<1x4x256xf32>
    %1 = vector.shape_cast %0 : vector<1x4x256xf32> to vector<4x256xf32>
    %c0_2 = arith.constant 0 : index
    %c0_3 = arith.constant 0 : index
    %2 = vector.load %arg9[%c0_2, %c0_3] : memref<48x1xf32, #tpu.memory_space<vmem>>, vector<8x1xf32>
    %c8 = arith.constant 8 : index
    %c0_4 = arith.constant 0 : index
    %3 = vector.load %arg9[%c8, %c0_4] : memref<48x1xf32, #tpu.memory_space<vmem>>, vector<8x1xf32>
    %c16 = arith.constant 16 : index
    %c0_5 = arith.constant 0 : index
    %4 = vector.load %arg9[%c16, %c0_5] : memref<48x1xf32, #tpu.memory_space<vmem>>, vector<4x1xf32>
    %c24 = arith.constant 24 : index
    %c0_6 = arith.constant 0 : index
    %5 = vector.load %arg9[%c24, %c0_6] : memref<48x1xf32, #tpu.memory_space<vmem>>, vector<4x1xf32>
    %c32 = arith.constant 32 : index
    %c0_7 = arith.constant 0 : index
    %6 = vector.load %arg9[%c32, %c0_7] : memref<48x1xf32, #tpu.memory_space<vmem>>, vector<8x1xf32>
    %c40 = arith.constant 40 : index
    %c0_8 = arith.constant 0 : index
    %7 = vector.load %arg9[%c40, %c0_8] : memref<48x1xf32, #tpu.memory_space<vmem>>, vector<4x1xf32>
    %c0_9 = arith.constant 0 : index
    %c0_10 = arith.constant 0 : index
    %8 = vector.load %arg3[%c0_9, %c0_10] : memref<8x4xf32, #tpu.memory_space<vmem>>, vector<8x4xf32>
    %cst = arith.constant dense<0.000000e+00> : vector<256xf32>
    %9 = vector.multi_reduction <add>, %1, %cst [0] : vector<4x256xf32> to vector<256xf32>
    %10 = vector.shape_cast %9 : vector<256xf32> to vector<1x256xf32>
    %cst_11 = arith.constant 4.000000e+00 : f32
    %11 = vector.broadcast %cst_11 : f32 to vector<1x256xf32>
    %12 = arith.divf %10, %11 : vector<1x256xf32>
    %13 = vector.broadcast %12 : vector<1x256xf32> to vector<4x256xf32>
    %14 = arith.subf %1, %13 : vector<4x256xf32>
    %15 = arith.mulf %14, %14 : vector<4x256xf32>
    %cst_12 = arith.constant dense<0.000000e+00> : vector<256xf32>
    %16 = vector.multi_reduction <add>, %15, %cst_12 [0] : vector<4x256xf32> to vector<256xf32>
    %17 = vector.shape_cast %16 : vector<256xf32> to vector<1x256xf32>
    %cst_13 = arith.constant 4.000000e+00 : f32
    %18 = vector.broadcast %cst_13 : f32 to vector<1x256xf32>
    %19 = arith.divf %17, %18 : vector<1x256xf32>
    %cst_14 = arith.constant 9.99999997E-7 : f32
    %20 = vector.broadcast %cst_14 : f32 to vector<1x256xf32>
    %21 = arith.addf %19, %20 : vector<1x256xf32>
    %22 = math.rsqrt %21 : vector<1x256xf32>
    %23 = vector.broadcast %22 : vector<1x256xf32> to vector<4x256xf32>
    %24 = arith.mulf %14, %23 : vector<4x256xf32>
    %cst_15 = arith.constant dense<0.000000e+00> : vector<8x256xf32>
    %25 = tpu.matmul %8, %24, %cst_15 {dimension_numbers = #tpu.dot_dimension_numbers<[1], [0], [0], [1], [0, 0, 1, 1], [], []>} : vector<8x4xf32>, vector<4x256xf32>, vector<8x256xf32> -> vector<8x256xf32>
    %26 = vector.broadcast %2 : vector<8x1xf32> to vector<8x256xf32>
    %27 = arith.addf %25, %26 : vector<8x256xf32>
    %cst_16 = arith.constant 0.000000e+00 : f32
    %28 = vector.broadcast %cst_16 : f32 to vector<8x128xf32>
    %c0_17 = arith.constant 0 : index
    %c0_18 = arith.constant 0 : index
    %29 = vector.load %arg11[%c0_17, %c0_18] : memref<8x512xf32, #tpu.memory_space<vmem>>, vector<8x128xf32>
    tpu.vector_store %arg11[%c0_17, %c0_18], %28 {strides = array<i32>} : memref<8x512xf32, #tpu.memory_space<vmem>>, vector<8x128xf32>,
    %cst_19 = arith.constant 0.000000e+00 : f32
    %30 = vector.broadcast %cst_19 : f32 to vector<8x128xf32>
    %c0_20 = arith.constant 0 : index
    %c384 = arith.constant 384 : index
    %31 = vector.load %arg11[%c0_20, %c384] : memref<8x512xf32, #tpu.memory_space<vmem>>, vector<8x128xf32>
    tpu.vector_store %arg11[%c0_20, %c384], %30 {strides = array<i32>} : memref<8x512xf32, #tpu.memory_space<vmem>>, vector<8x128xf32>,
    %c0_21 = arith.constant 0 : index
    %c128 = arith.constant 128 : index
    %32 = vector.load %arg11[%c0_21, %c128] : memref<8x512xf32, #tpu.memory_space<vmem>>, vector<8x256xf32>
    tpu.vector_store %arg11[%c0_21, %c128], %27 {strides = array<i32>} : memref<8x512xf32, #tpu.memory_space<vmem>>, vector<8x256xf32>,
    %c0_22 = arith.constant 0 : index
    %c112 = arith.constant 112 : index
    %33 = vector.load %arg11[%c0_22, %c112] : memref<8x512xf32, #tpu.memory_space<vmem>>, vector<8x256xf32>
    %c0_23 = arith.constant 0 : index
    %c144 = arith.constant 144 : index
    %34 = vector.load %arg11[%c0_23, %c144] : memref<8x512xf32, #tpu.memory_space<vmem>>, vector<8x256xf32>
    %c0_24 = arith.constant 0 : index
    %c0_25 = arith.constant 0 : index
    %35 = vector.load %arg2[%c0_24, %c0_25] : memref<1x256xi32, #tpu.memory_space<vmem>>, vector<1x256xi32>
    %c1_i32 = arith.constant 1 : i32
    %36 = vector.broadcast %c1_i32 : i32 to vector<1x256xi32>
    %37 = arith.cmpi sge, %35, %36 : vector<1x256xi32>
    %c14_i32 = arith.constant 14 : i32
    %38 = vector.broadcast %c14_i32 : i32 to vector<1x256xi32>
    %39 = arith.cmpi sle, %35, %38 : vector<1x256xi32>
    %c0_26 = arith.constant 0 : index
    %c0_27 = arith.constant 0 : index
    %40 = vector.load %arg4[%c0_26, %c0_27] : memref<8x9xf32, #tpu.memory_space<vmem>>, vector<8x9xf32>
    %41 = vector.extract_strided_slice %40 {offsets = [0, 4], sizes = [8, 1], strides = [1, 1]} : vector<8x9xf32> to vector<8x1xf32>
    %42 = vector.broadcast %41 : vector<8x1xf32> to vector<8x256xf32>
    %43 = arith.mulf %27, %42 : vector<8x256xf32>
    %44 = vector.extract_strided_slice %40 {offsets = [0, 1], sizes = [8, 1], strides = [1, 1]} : vector<8x9xf32> to vector<8x1xf32>
    %45 = vector.broadcast %44 : vector<8x1xf32> to vector<8x256xf32>
    %46 = arith.mulf %33, %45 : vector<8x256xf32>
    %47 = arith.addf %43, %46 : vector<8x256xf32>
    %48 = vector.extract_strided_slice %40 {offsets = [0, 7], sizes = [8, 1], strides = [1, 1]} : vector<8x9xf32> to vector<8x1xf32>
    %49 = vector.broadcast %48 : vector<8x1xf32> to vector<8x256xf32>
    %50 = arith.mulf %34, %49 : vector<8x256xf32>
    %51 = arith.addf %47, %50 : vector<8x256xf32>
    %c1_i32_28 = arith.constant 1 : i32
    %52 = tpu.dynamic_rotate %33 by %c1_i32_28 dim 1 : vector<8x256xf32>, i32 -> vector<8x256xf32>
    %53 = vector.extract_strided_slice %40 {offsets = [0, 0], sizes = [8, 1], strides = [1, 1]} : vector<8x9xf32> to vector<8x1xf32>
    %54 = vector.broadcast %53 : vector<8x1xf32> to vector<8x256xf32>
    %55 = arith.mulf %52, %54 : vector<8x256xf32>
    %c1_i32_29 = arith.constant 1 : i32
    %56 = tpu.dynamic_rotate %27 by %c1_i32_29 dim 1 : vector<8x256xf32>, i32 -> vector<8x256xf32>
    %57 = vector.extract_strided_slice %40 {offsets = [0, 3], sizes = [8, 1], strides = [1, 1]} : vector<8x9xf32> to vector<8x1xf32>
    %58 = vector.broadcast %57 : vector<8x1xf32> to vector<8x256xf32>
    %59 = arith.mulf %56, %58 : vector<8x256xf32>
    %60 = arith.addf %55, %59 : vector<8x256xf32>
    %c1_i32_30 = arith.constant 1 : i32
    %61 = tpu.dynamic_rotate %34 by %c1_i32_30 dim 1 : vector<8x256xf32>, i32 -> vector<8x256xf32>
    %62 = vector.extract_strided_slice %40 {offsets = [0, 6], sizes = [8, 1], strides = [1, 1]} : vector<8x9xf32> to vector<8x1xf32>
    %63 = vector.broadcast %62 : vector<8x1xf32> to vector<8x256xf32>
    %64 = arith.mulf %61, %63 : vector<8x256xf32>
    %65 = arith.addf %60, %64 : vector<8x256xf32>
    %c255_i32 = arith.constant 255 : i32
    %66 = tpu.dynamic_rotate %33 by %c255_i32 dim 1 : vector<8x256xf32>, i32 -> vector<8x256xf32>
    %67 = vector.extract_strided_slice %40 {offsets = [0, 2], sizes = [8, 1], strides = [1, 1]} : vector<8x9xf32> to vector<8x1xf32>
    %68 = vector.broadcast %67 : vector<8x1xf32> to vector<8x256xf32>
    %69 = arith.mulf %66, %68 : vector<8x256xf32>
    %c255_i32_31 = arith.constant 255 : i32
    %70 = tpu.dynamic_rotate %27 by %c255_i32_31 dim 1 : vector<8x256xf32>, i32 -> vector<8x256xf32>
    %71 = vector.extract_strided_slice %40 {offsets = [0, 5], sizes = [8, 1], strides = [1, 1]} : vector<8x9xf32> to vector<8x1xf32>
    %72 = vector.broadcast %71 : vector<8x1xf32> to vector<8x256xf32>
    %73 = arith.mulf %70, %72 : vector<8x256xf32>
    %74 = arith.addf %69, %73 : vector<8x256xf32>
    %c255_i32_32 = arith.constant 255 : i32
    %75 = tpu.dynamic_rotate %34 by %c255_i32_32 dim 1 : vector<8x256xf32>, i32 -> vector<8x256xf32>
    %76 = vector.extract_strided_slice %40 {offsets = [0, 8], sizes = [8, 1], strides = [1, 1]} : vector<8x9xf32> to vector<8x1xf32>
    %77 = vector.broadcast %76 : vector<8x1xf32> to vector<8x256xf32>
    %78 = arith.mulf %75, %77 : vector<8x256xf32>
    %79 = arith.addf %74, %78 : vector<8x256xf32>
    %cst_33 = arith.constant 0.000000e+00 : f32
    %80 = vector.shape_cast %37 : vector<1x256xi1> to vector<1x256xi1>
    %81 = vector.broadcast %80 : vector<1x256xi1> to vector<8x256xi1>
    %82 = vector.broadcast %cst_33 : f32 to vector<8x256xf32>
    %83 = arith.select %81, %65, %82 : vector<8x256xi1>, vector<8x256xf32>
    %84 = arith.addf %51, %83 : vector<8x256xf32>
    %cst_34 = arith.constant 0.000000e+00 : f32
    %85 = vector.shape_cast %39 : vector<1x256xi1> to vector<1x256xi1>
    %86 = vector.broadcast %85 : vector<1x256xi1> to vector<8x256xi1>
    %87 = vector.broadcast %cst_34 : f32 to vector<8x256xf32>
    %88 = arith.select %86, %79, %87 : vector<8x256xi1>, vector<8x256xf32>
    %89 = arith.addf %84, %88 : vector<8x256xf32>
    %90 = vector.broadcast %3 : vector<8x1xf32> to vector<8x256xf32>
    %91 = arith.addf %89, %90 : vector<8x256xf32>
    %92 = vector.extract_strided_slice %91 {offsets = [0, 0], sizes = [4, 256], strides = [1, 1]} : vector<8x256xf32> to vector<4x256xf32>
    %93 = vector.extract_strided_slice %91 {offsets = [4, 0], sizes = [4, 256], strides = [1, 1]} : vector<8x256xf32> to vector<4x256xf32>
    %94 = arith.mulf %92, %93 : vector<4x256xf32>
    %cst_35 = arith.constant dense<0.000000e+00> : vector<4xf32>
    %95 = vector.multi_reduction <add>, %94, %cst_35 [1] : vector<4x256xf32> to vector<4xf32>
    %96 = vector.shape_cast %95 : vector<4xf32> to vector<4x1xf32>
    %cst_36 = arith.constant 3.906250e-03 : f32
    %97 = vector.broadcast %cst_36 : f32 to vector<4x1xf32>
    %98 = arith.mulf %96, %97 : vector<4x1xf32>
    %c0_37 = arith.constant 0 : index
    %c0_38 = arith.constant 0 : index
    %99 = vector.load %arg5[%c0_37, %c0_38] : memref<4x4xf32, #tpu.memory_space<vmem>>, vector<4x4xf32>
    %cst_39 = arith.constant dense<0.000000e+00> : vector<4x1xf32>
    %100 = tpu.matmul %99, %98, %cst_39 {dimension_numbers = #tpu.dot_dimension_numbers<[1], [0], [0], [1], [0, 0, 1, 1], [], []>} : vector<4x4xf32>, vector<4x1xf32>, vector<4x1xf32> -> vector<4x1xf32>
    %101 = arith.addf %100, %4 : vector<4x1xf32>
    %102 = vector.broadcast %101 : vector<4x1xf32> to vector<4x256xf32>
    %103 = arith.mulf %94, %102 : vector<4x256xf32>
    %c0_40 = arith.constant 0 : index
    %c0_41 = arith.constant 0 : index
    %104 = vector.load %arg6[%c0_40, %c0_41] : memref<4x4xf32, #tpu.memory_space<vmem>>, vector<4x4xf32>
    %cst_42 = arith.constant dense<0.000000e+00> : vector<4x256xf32>
    %105 = tpu.matmul %104, %103, %cst_42 {dimension_numbers = #tpu.dot_dimension_numbers<[1], [0], [0], [1], [0, 0, 1, 1], [], []>} : vector<4x4xf32>, vector<4x256xf32>, vector<4x256xf32> -> vector<4x256xf32>
    %106 = arith.addf %1, %105 : vector<4x256xf32>
    %107 = vector.broadcast %5 : vector<4x1xf32> to vector<4x256xf32>
    %108 = arith.addf %106, %107 : vector<4x256xf32>
    %c0_43 = arith.constant 0 : index
    %c0_44 = arith.constant 0 : index
    %109 = vector.load %arg7[%c0_43, %c0_44] : memref<8x4xf32, #tpu.memory_space<vmem>>, vector<8x4xf32>
    %cst_45 = arith.constant dense<0.000000e+00> : vector<256xf32>
    %110 = vector.multi_reduction <add>, %108, %cst_45 [0] : vector<4x256xf32> to vector<256xf32>
    %111 = vector.shape_cast %110 : vector<256xf32> to vector<1x256xf32>
    %cst_46 = arith.constant 4.000000e+00 : f32
    %112 = vector.broadcast %cst_46 : f32 to vector<1x256xf32>
    %113 = arith.divf %111, %112 : vector<1x256xf32>
    %114 = vector.broadcast %113 : vector<1x256xf32> to vector<4x256xf32>
    %115 = arith.subf %108, %114 : vector<4x256xf32>
    %116 = arith.mulf %115, %115 : vector<4x256xf32>
    %cst_47 = arith.constant dense<0.000000e+00> : vector<256xf32>
    %117 = vector.multi_reduction <add>, %116, %cst_47 [0] : vector<4x256xf32> to vector<256xf32>
    %118 = vector.shape_cast %117 : vector<256xf32> to vector<1x256xf32>
    %cst_48 = arith.constant 4.000000e+00 : f32
    %119 = vector.broadcast %cst_48 : f32 to vector<1x256xf32>
    %120 = arith.divf %118, %119 : vector<1x256xf32>
    %cst_49 = arith.constant 9.99999997E-7 : f32
    %121 = vector.broadcast %cst_49 : f32 to vector<1x256xf32>
    %122 = arith.addf %120, %121 : vector<1x256xf32>
    %123 = math.rsqrt %122 : vector<1x256xf32>
    %124 = vector.broadcast %123 : vector<1x256xf32> to vector<4x256xf32>
    %125 = arith.mulf %115, %124 : vector<4x256xf32>
    %cst_50 = arith.constant dense<0.000000e+00> : vector<8x256xf32>
    %126 = tpu.matmul %109, %125, %cst_50 {dimension_numbers = #tpu.dot_dimension_numbers<[1], [0], [0], [1], [0, 0, 1, 1], [], []>} : vector<8x4xf32>, vector<4x256xf32>, vector<8x256xf32> -> vector<8x256xf32>
    %127 = vector.broadcast %6 : vector<8x1xf32> to vector<8x256xf32>
    %128 = arith.addf %126, %127 : vector<8x256xf32>
    %129 = vector.extract_strided_slice %128 {offsets = [0, 0], sizes = [4, 256], strides = [1, 1]} : vector<8x256xf32> to vector<4x256xf32>
    %130 = vector.extract_strided_slice %128 {offsets = [4, 0], sizes = [4, 256], strides = [1, 1]} : vector<8x256xf32> to vector<4x256xf32>
    %131 = arith.mulf %129, %130 : vector<4x256xf32>
    %c0_51 = arith.constant 0 : index
    %c0_52 = arith.constant 0 : index
    %132 = vector.load %arg8[%c0_51, %c0_52] : memref<4x4xf32, #tpu.memory_space<vmem>>, vector<4x4xf32>
    %cst_53 = arith.constant dense<0.000000e+00> : vector<4x256xf32>
    %133 = tpu.matmul %132, %131, %cst_53 {dimension_numbers = #tpu.dot_dimension_numbers<[1], [0], [0], [1], [0, 0, 1, 1], [], []>} : vector<4x4xf32>, vector<4x256xf32>, vector<4x256xf32> -> vector<4x256xf32>
    %134 = arith.addf %108, %133 : vector<4x256xf32>
    %135 = vector.broadcast %7 : vector<4x1xf32> to vector<4x256xf32>
    %136 = arith.addf %134, %135 : vector<4x256xf32>
    %c0_54 = arith.constant 0 : index
    %c0_55 = arith.constant 0 : index
    %c0_56 = arith.constant 0 : index
    %137 = vector.load %arg10[%c0_54, %c0_55, %c0_56] : memref<1x4x256xf32, #tpu.memory_space<vmem>>, vector<1x4x256xf32>
    %138 = vector.shape_cast %137 : vector<1x4x256xf32> to vector<4x256xf32>
    %139 = vector.shape_cast %136 : vector<4x256xf32> to vector<1x4x256xf32>
    tpu.vector_store %arg10[%c0_54, %c0_55, %c0_56], %139 {strides = array<i32>} : memref<1x4x256xf32, #tpu.memory_space<vmem>>, vector<1x4x256xf32>,
    return
  }
  func.func @transform_0(%arg0: i32) -> (i32, i32, i32) {
    %c0_i32 = arith.constant 0 : i32
    %c0_i32_0 = arith.constant 0 : i32
    %c0_i32_1 = arith.constant 0 : i32
    return %arg0, %c0_i32, %c0_i32_0 : i32, i32, i32
  }
  func.func @transform_1(%arg0: i32) -> (i32, i32) {
    %c0_i32 = arith.constant 0 : i32
    %c0_i32_0 = arith.constant 0 : i32
    %c0_i32_1 = arith.constant 0 : i32
    return %c0_i32, %c0_i32_0 : i32, i32
  }
  func.func @transform_2(%arg0: i32) -> (i32, i32) {
    %c0_i32 = arith.constant 0 : i32
    %c0_i32_0 = arith.constant 0 : i32
    %c0_i32_1 = arith.constant 0 : i32
    return %c0_i32, %c0_i32_0 : i32, i32
  }
  func.func @transform_3(%arg0: i32) -> (i32, i32) {
    %c0_i32 = arith.constant 0 : i32
    %c0_i32_0 = arith.constant 0 : i32
    %c0_i32_1 = arith.constant 0 : i32
    return %c0_i32, %c0_i32_0 : i32, i32
  }
  func.func @transform_4(%arg0: i32) -> (i32, i32) {
    %c0_i32 = arith.constant 0 : i32
    %c0_i32_0 = arith.constant 0 : i32
    %c0_i32_1 = arith.constant 0 : i32
    return %c0_i32, %c0_i32_0 : i32, i32
  }
  func.func @transform_5(%arg0: i32) -> (i32, i32) {
    %c0_i32 = arith.constant 0 : i32
    %c0_i32_0 = arith.constant 0 : i32
    %c0_i32_1 = arith.constant 0 : i32
    return %c0_i32, %c0_i32_0 : i32, i32
  }
  func.func @transform_6(%arg0: i32) -> (i32, i32) {
    %c0_i32 = arith.constant 0 : i32
    %c0_i32_0 = arith.constant 0 : i32
    %c0_i32_1 = arith.constant 0 : i32
    return %c0_i32, %c0_i32_0 : i32, i32
  }
  func.func @transform_7(%arg0: i32) -> (i32, i32) {
    %c0_i32 = arith.constant 0 : i32
    %c0_i32_0 = arith.constant 0 : i32
    %c0_i32_1 = arith.constant 0 : i32
    return %c0_i32, %c0_i32_0 : i32, i32
  }
  func.func @transform_8(%arg0: i32) -> (i32, i32) {
    %c0_i32 = arith.constant 0 : i32
    %c0_i32_0 = arith.constant 0 : i32
    %c0_i32_1 = arith.constant 0 : i32
    return %c0_i32, %c0_i32_0 : i32, i32
  }
  func.func @transform_9(%arg0: i32) -> (i32, i32, i32) {
    %c0_i32 = arith.constant 0 : i32
    %c0_i32_0 = arith.constant 0 : i32
    %c0_i32_1 = arith.constant 0 : i32
    return %arg0, %c0_i32, %c0_i32_0 : i32, i32, i32
  }
}

</mosaic_0001>

<bundles_post_ra>
// kernel: tpu_custom_call.1
= control target key start
LH: loop header
LB: loop body
LE: loop exit
PB: predicated region body
PF: predicated region fallthrough
CT: control target
= control target key end

     0   :  { %14 = vsyncpa [#allocation4], 0  ;;  %s1717_s0 = inlined_call_operand.vmem [shape: f32[2,4,256], index: 0, kind: input, shape index: {}]   ;;  %s1718_s1 = inlined_call_operand.vmem [shape: s32[1,256], index: 1, kind: input, shape index: {}]   ;;  %s1719_s2 = inlined_call_operand.vmem [shape: f32[8,4], index: 2, kind: input, shape index: {}]   ;;  %s1720_s3 = inlined_call_operand.vmem [shape: f32[8,9], index: 3, kind: input, shape index: {}]   ;;  %s1721_s4 = inlined_call_operand.vmem [shape: f32[4,4], index: 4, kind: input, shape index: {}]   ;;  %s1722_s5 = inlined_call_operand.vmem [shape: f32[4,4], index: 5, kind: input, shape index: {}]   ;;  %s1723_s6 = inlined_call_operand.vmem [shape: f32[8,4], index: 6, kind: input, shape index: {}]   ;;  %s1724_s7 = inlined_call_operand.vmem [shape: f32[4,4], index: 7, kind: input, shape index: {}]   ;;  %s1725_s8 = inlined_call_operand.vmem [shape: f32[48,1], index: 8, kind: input, shape index: {}]   ;;  %s1726_s9 = inlined_call_operand.hbm [shape: f32[2,4,256], index: 9, kind: output, shape index: {}]  }
   0x1   :  { %16 = vsyncpa [#allocation4 + $0x1], 0  ;;  %s1450_s30 = smov 0   ;;  %s1452_s10 = smov 0  }
   0x2   :  { %s1454_s11 = smov 0   ;;  %s1456_s12 = smov 0  }
   0x3 LB: > { %s1471_s13 = sadd.s32 4294967295, %s1381_s12   ;;  %s1212_s14 = sadd.s32 4294967294, %s1381_s12   ;;  %s1381_s12 = sphi %s1456_s12, %s1732_s12   ;;  %s1377_s11 = sphi %s1454_s11, %s1731_s11   ;;  %s1373_s10 = sphi %s1452_s10, %s1730_s10   ;;  %s1369_s30 = sphi %s1450_s30, %s1729_s30  }
   0x4   : > { %s1475_s15 = sadd.s32 1, %s1381_s12   ;;  %s223_s16 = sadd.s32 1, %s1377_s11 }
   0x5   : > { %s220_s17 = ssub.s32 %s1381_s12, %s1475_s15  ;;  %p233_p0 = scmp.ne.s32.totalorder %s1377_s11, %s1373_s10 }
   0x6   : > { %p221_p1 = scmp.eq.s32.totalorder %s220_s17, 0  ;;  %p234_p2 = scmp.eq.s32.totalorder %s1471_s13, 1 }
   0x7   : > { %p239_p3 = scmp.ne.s32.totalorder %s1373_s10, %s1369_s30  ;;  %p240_p4 = scmp.eq.s32.totalorder %s1212_s14, 1 }
   0x8   : > { %s1486_s18 = scalar_select %p221_p1, %s1377_s11, %s223_s16  }
   0x9   : > { %p1488_p5 = por %p234_p2, %p233_p0  ;;  %p1492_p6 = por %p240_p4, %p239_p3 }
   0xa   : > { %p1215_p7 = scmp.ge.s32.totalorder %s1381_s12, 1  ;;  %p290_p8 = scmp.lt.s32.totalorder %s1381_s12, 3 }
   0xc   : > { %p291_p9 = pnand %p1215_p7, %p290_p8 }
   0xd   : > { %p326_p10 = scmp.lt.s32.totalorder (!%p291_p9), %s1471_s13, 1  ;;  %s1387_s14 = smov (!%p291_p9), 16  }
   0xe   : > { %294 = sbr.rel (%p291_p9) target bundleno = 1698 (0x6a2), region = 56  ;;  %s1390_s21 = smov (!%p291_p9), 112  }
   0xf   : > { %s1391_s22 = smov (!%p291_p9), 1   ;;  %s1396_s23 = smov (!%p291_p9), 127  }
  0x10   : > { %s323_s17 = sand.u32 (!%p291_p9), 1, %s1373_s10  }
  0x11   : > { %s1139_s28 = scalar_lea.sflag (!%p291_p9), [#allocation4], %s323_s17 }
  0x13   : > { %v1383_v0 = vmov 0.0   ;;  %v1384_v1 = vmov 0   ;;  %v332_v2 = vld [vmem:[%s1725_s8] sm:$0xff]  ;;  %s327_s25 = scalar_select %p326_p10, %s1471_s13, 1  ;;  %v1385_v4 = vmov 7   ;;  %vm342_vm0 = vcmask 1043456  }
  0x14   : > { %473 = vmatprep.mubr.f32.mxu0 %v1383_v0  ;;  %1302 = vset.pattern.permute.xlu0 %v1384_v1  ;;  %v1507_v3 = vld [vmem:[%s1720_s3] sm:$0xff]  ;;  %v1386_v6 = vmov 1   ;;  %vm401_vm1 = vcmask 31744   ;;  %v1388_v52 = vmov 6   ;;  %v1389_v53 = vmov 3  }
  0x15   : > { %396 = vperm.xlu0 %1302, %v332_v2   ;;  %1304 = vset.pattern.permute.xlu1 %v1385_v4  ;;  %s1238_s26 = sshll.u32 %s327_s25, 3  ;;  %v338_v51 = vld [vmem:[%s1719_s2] sm:$0xff]  ;;  %v1392_v59 = vmov 8   ;;  %v1393_v60 = vmov 4   ;;  %v1394_v61 = vmov 2   ;;  %v1395_v63 = vmov 5  }
  0x16   : > { %525 = vperm.xlu1 %1304, %v1507_v3   ;;  %1242 = vmatprep.subr.mxu1 %v1383_v0  ;;  %s330_s29 = scalar_lea.vmem %s1717_s0, %s1238_s26  ;;  %vm517_vm2 = vcmask 130048   ;;  %vm540_vm3 = vcmask 916480   ;;  %vm1397_vm12 = vmmov 0  }
  0x17   : > { %v1515_v5 = vld [vmem:[%s330_s29] sm:$0xff]  ;;  %1244 = vmatprep.mubr.msk.f32.mxu1 %vm1397_vm12, %v1383_v0 }
  0x18   : > { %v340_v7 = vcombine.high %v1515_v5, %v1515_v5  ;;  %v343_v8 = vsel %vm342_vm0, %v1515_v5, 0.0 }
  0x19   : > { %1303 = vset.pattern.permute.xlu0 %v1386_v6  ;;  %v344_v9 = vrot.slane %v343_v8, 4 }
  0x1a   : > { %502 = vperm.xlu0 %1303, %v1507_v3   ;;  %550 = vrot.lane.b32.xlu1 %v1383_v0, %s1387_s14  ;;  %v350_v10 = vsel %vm342_vm0, %v340_v7, 0.0 }
  0x1b   : > { %v345_v11 = vadd.f32 %v344_v9, %v343_v8  ;;  %v351_v12 = vrot.slane %v350_v10, 4  ;;  %1305 = vset.pattern.permute.xlu1 %v1389_v53 }
  0x1d   : > { %v346_v13 = vrot.slane %v345_v11, 2  ;;  %v352_v14 = vadd.f32 %v351_v12, %v350_v10 }
  0x1e   : > { %1307 = vset.pattern.permute.xlu0 %v1388_v52 }
  0x1f   : > { %v347_v15 = vadd.f32 %v346_v13, %v345_v11  ;;  %v353_v16 = vrot.slane %v352_v14, 2 }
  0x21   : > { %v348_v17 = vrot.slane %v347_v15, 1  ;;  %v354_v18 = vadd.f32 %v353_v16, %v352_v14 }
  0x23   : > { %v349_v19 = vadd.f32 %v348_v17, %v347_v15  ;;  %v355_v20 = vrot.slane %v354_v18, 1 }
  0x25   : > { %v356_v21 = vadd.f32 %v355_v20, %v354_v18  ;;  %v358_v22 = vmul.f32 0.25, %v349_v19  ;;  %v333_v19 = vld [vmem:[%s1725_s8 + $0x8] sm:$0xff] }
  0x27   : > { %v359_v23 = vmul.f32 0.25, %v356_v21 }
  0x29   : > { %v362_v24 = vcombine.low %v358_v22, %v359_v23 }
  0x2b   : > { %v364_v25 = vsub.f32 %v1515_v5, %v362_v24 }
  0x2d   : > { %v365_v26 = vmul.f32 %v364_v25, %v364_v25 }
  0x2f   : > { %v367_v27 = vcombine.high %v365_v26, %v365_v26  ;;  %v369_v28 = vsel %vm342_vm0, %v365_v26, 0.0 }
  0x30   : > { %v370_v29 = vrot.slane %v369_v28, 4 }
  0x31   : > { %v376_v30 = vsel %vm342_vm0, %v367_v27, 0.0 }
  0x32   : > { %v371_v31 = vadd.f32 %v370_v29, %v369_v28  ;;  %v377_v32 = vrot.slane %v376_v30, 4 }
  0x34   : > { %v372_v33 = vrot.slane %v371_v31, 2  ;;  %v378_v34 = vadd.f32 %v377_v32, %v376_v30 }
  0x36   : > { %v373_v35 = vadd.f32 %v372_v33, %v371_v31  ;;  %v379_v36 = vrot.slane %v378_v34, 2 }
  0x38   : > { %v374_v37 = vrot.slane %v373_v35, 1  ;;  %v380_v38 = vadd.f32 %v379_v36, %v378_v34 }
  0x3a   : > { %v375_v39 = vadd.f32 %v374_v37, %v373_v35  ;;  %v381_v40 = vrot.slane %v380_v38, 1  ;;  %v564_v35 = vlaneseq  ;;  %v490_v37 = vld [vmem:[%s1718_s1] sm:$0x3] }
  0x3b   : > { %vm491_vm4 = vcmp.ge.s32.totalorder %v490_v37, 1  ;;  %vm492_vm6 = vcmp.le.s32.totalorder %v490_v37, 14 }
  0x3c   : > { %v382_v41 = vadd.f32 %v381_v40, %v380_v38  ;;  %v383_v42 = vmul.f32 0.25, %v375_v39  ;;  %v1595_v38 = vshrl.u32 %v564_v35, 7  ;;  %v565_v39 = vand.u32 127, %v564_v35 }
  0x3e   : > { %v384_v43 = vmul.f32 0.25, %v382_v41  ;;  %v385_v44 = vadd.f32 1e-06, %v383_v42  ;;  %v660_v42 = vsub.s32 0, %v1595_v38  ;;  %vm566_vm5 = vcmp.lt.s32.totalorder %v565_v39, 1 }
  0x3f   : > { %vm620_vm7 = vcmp.lt.s32.totalorder %v565_v39, 127 }
  0x40   : > { %v386_v45 = vadd.f32 1e-06, %v384_v43  ;;  %1313 = vrsqrt.f32 %v385_v44  ;;  %v657_v43 = vsel %vm491_vm4, 1, %v1384_v1 }
  0x42   : > { %1315 = vrsqrt.f32 %v386_v45 }
  0x4d   : > { %v1314_v46 = vpop.eup %1313 }
  0x4f   : > { %v1316_v47 = vpop.eup %1315 }
  0x50   : > { %v391_v48 = vcombine.low %v1314_v46, %v1316_v47 }
  0x52   : > { %v393_v49 = vmul.f32 %v391_v48, %v364_v25  ;;  %v664_v48 = vsub.s32 1, %v1595_v38 }
  0x54   : > { %v400_v50 = vcombine.high %v393_v49, %v393_v49 }
  0x56   : > { %1219 = vmatprep.subr.msk.mxu0 %vm342_vm0, %v400_v50  ;;  %v672_v50 = vsel %vm492_vm6, 1, %v1384_v1 }
  0x57   : > { %1220 = vmatpush1.msk.msra.mxu0 %vm342_vm0, %v393_v49  ;;  %v661_v49 = vrot.slane %v657_v43, %v660_v42 }
  0x58   : > { %1221 = vmatmul.mubr.msk.f32.vlgmr.msra.gmra.mxu0 %vm401_vm1, %v338_v51 }
  0x59   : > { %866 = vmatprep.mubr.f32.mxu0 %v1383_v0  ;;  %vm666_vm8 = vcmp.eq.s32.totalorder %v661_v49, 1 }
  0x90   : > { %v397_v54 = vpop.permute.xlu0 %396 }
  0x91   : > { %v526_v6 = vpop.permute.xlu1 %525 }
  0x92   : > { %v530_v20 = vmul.f32 0.0, %v526_v6 }
  0x95   : > { %v503_v62 = vpop.permute.xlu0 %502  ;;  %v551_v9 = vpop.permute.xlu1 %550 }
  0x96   : > { %v505_v2 = vmul.f32 0.0, %v503_v62 }
 0x118   : > { %v475_v55 = vpop.f32.mrf.mxu0 }
 0x119   : > { %v1535_v56 = vadd.f32 %v475_v55, %v397_v54 }
 0x11a   : > { %v477_v57 = vpop.f32.mrf.mxu0 }
 0x11b   : > { %v1537_v58 = vadd.f32 %v477_v57, %v397_v54  ;;  %552 = vrot.lane.b32.xlu1 %v1535_v56, %s1387_s14  ;;  %v506_v7 = vmul.f32 %v503_v62, %v1535_v56 }
 0x11d   : > { %554 = vrot.lane.b32.xlu0 %v1537_v58, %s1387_s14  ;;  %v507_v4 = vmul.f32 %v503_v62, %v1537_v58  ;;  %v529_v8 = vmul.f32 %v526_v6, %v1537_v58  ;;  %v665_v62 = vrot.slane %v657_v43, %v664_v48 }
 0x11f   : > { %592 = vrot.lane.b32.xlu1 %v1535_v56, %s1390_s21  ;;  %vm667_vm10 = vcmp.eq.s32.totalorder %v665_v62, 1  ;;  %v334_v62 = vld [vmem:[%s1725_s8 + $0x10] sm:$0xf] }
 0x121   : > { %594 = vrot.lane.b32.xlu0 %v1537_v58, %s1390_s21 }
 0x123   : > { %596 = vrot.lane.b32.xlu1 %v1383_v0, %s1390_s21 }
 0x125   : > { %609 = vperm.xlu0 %1307, %v1507_v3  }
 0x127   : > { %582 = vperm.xlu1 %1305, %v1507_v3  }
 0x129   : > { %575 = vrot.lane.b32.xlu0 %v1535_v56, %s1391_s22 }
 0x12a   : > { %1310 = vset.pattern.permute.xlu0 %v1392_v59 }
 0x12b   : > { %1306 = vset.pattern.permute.xlu1 %v1393_v60  ;;  %v680_v60 = vrot.slane %v672_v50, %v664_v48 }
 0x12c   : > { %496 = vperm.xlu1 %1306, %v1507_v3  }
 0x12d   : > { %650 = vperm.xlu0 %1310, %v1507_v3   ;;  %vm682_vm11 = vcmp.eq.s32.totalorder %v680_v60, 1 }
 0x130   : > { %1308 = vset.pattern.permute.xlu1 %v1394_v61  ;;  %v676_v61 = vrot.slane %v672_v50, %v660_v42 }
 0x131   : > { %1311 = vset.pattern.permute.xlu0 %v1384_v1  ;;  %624 = vperm.xlu1 %1308, %v1507_v3  }
 0x132   : > { %570 = vperm.xlu0 %1311, %v1507_v3   ;;  %vm681_vm9 = vcmp.eq.s32.totalorder %v676_v61, 1  ;;  %v708_v61 = vld [vmem:[%s1721_s4] sm:$0xf] }
 0x135   : > { %1309 = vset.pattern.permute.xlu1 %v1395_v63 }
 0x136   : > { %629 = vrot.lane.b32.xlu0 %v1535_v56, %s1396_s23  ;;  %636 = vperm.xlu1 %1309, %v1507_v3   ;;  %v528_v3 = vmul.f32 %v526_v6, %v1535_v56 }
 0x13a   : > { %511 = vrot.lane.b32.xlu0 %v505_v2, %s1387_s14  ;;  %577 = vrot.lane.b32.xlu1 %v1537_v58, %s1391_s22 }
 0x13e   : > { %515 = vrot.lane.b32.xlu0 %v507_v4, %s1387_s14  ;;  %631 = vrot.lane.b32.xlu1 %v1537_v58, %s1396_s23 }
 0x142   : > { %536 = vrot.lane.b32.xlu0 %v529_v8, %s1390_s21  ;;  %513 = vrot.lane.b32.xlu1 %v506_v7, %s1387_s14 }
 0x146   : > { %534 = vrot.lane.b32.xlu1 %v528_v3, %s1390_s21 }
 0x18d   : > { %v553_v10 = vpop.permute.xlu1 %552 }
 0x18e   : > { %v556_v11 = vsel %vm517_vm2, %v551_v9, %v553_v10 }
 0x18f   : > { %v555_v12 = vpop.permute.xlu0 %554  ;;  %560 = vrot.lane.b32.xlu0 %v556_v11, %s1391_s22 }
 0x190   : > { %v557_v13 = vsel %vm517_vm2, %v553_v10, %v555_v12 }
 0x191   : > { %v593_v14 = vpop.permute.xlu1 %592  ;;  %562 = vrot.lane.b32.xlu1 %v557_v13, %s1391_s22 }
 0x193   : > { %v595_v15 = vpop.permute.xlu0 %594  ;;  %616 = vrot.lane.b32.xlu0 %v556_v11, %s1396_s23 }
 0x194   : > { %v598_v16 = vsel %vm540_vm3, %v593_v14, %v595_v15 }
 0x195   : > { %v597_v17 = vpop.permute.xlu1 %596  ;;  %602 = vrot.lane.b32.xlu1 %v598_v16, %s1391_s22 }
 0x196   : > { %v599_v18 = vsel %vm540_vm3, %v595_v15, %v597_v17 }
 0x197   : > { %645 = vrot.lane.b32.xlu0 %v599_v18, %s1396_s23 }
 0x199   : > { %604 = vrot.lane.b32.xlu1 %v599_v18, %s1391_s22  ;;  %s1239_s22 = sshll.u32 %s1471_s13, 7  ;;  %s1399_s13 = smov [#allocation3]  }
 0x19a   : > { %s1151_s27 = scalar_lea.hbm %s1726_s9, %s1239_s22  ;;  %s1325_s14 = sshll.u32 %s1399_s13, 4  ;;  %s1326_s14 = int_to_ptr.vmem [resolvable:$false] %s1325_s14 }
 0x19b   : > { %689 = vperm.xlu0 %1311, %v333_v19   ;;  %s1327_s16 = scalar_lea.vmem %s1326_s14, 256 }
 0x19d   : > { %618 = vrot.lane.b32.xlu1 %v557_v13, %s1396_s23 }
 0x1a0   : > { %v610_v22 = vpop.permute.xlu0 %609 }
 0x1a1   : > { %643 = vrot.lane.b32.xlu1 %v598_v16, %s1396_s23 }
 0x1a2   : > { %v583_v21 = vpop.permute.xlu1 %582 }
 0x1a4   : > { %v576_v24 = vpop.permute.xlu0 %575 }
 0x1a5   : > { %538 = vrot.lane.b32.xlu1 %v530_v20, %s1390_s21  ;;  %s1216_s21 = sshll.u32 %s323_s17, 3 }
 0x1a6   : > { %s325_s23 = scalar_lea.vmem [#allocation3], %s1216_s21 }
 0x1a7   : > { %v497_v23 = vpop.permute.xlu1 %496  ;;  %s1153_s24 = sshll.u32 %s325_s23, 4  ;;  %s1154_s24 = int_to_ptr.vmem [resolvable:$true] %s1153_s24 }
 0x1a8   : > { %v1590_v26 = vpop.permute.xlu0 %650  ;;  %v499_v10 = vmul.f32 %v497_v23, %v1535_v56  ;;  %v500_v14 = vmul.f32 %v497_v23, %v1537_v58  ;;  %s1321_s29 = scalar_lea.vmem %s1154_s24, 128  ;;  %p1328_p0 = scmp.lt.s32.totalorder %s1154_s24, %s1326_s14 }
 0x1a9   : > { %p1322_p11 = scmp.ne.s32.totalorder %s1154_s24, %s1321_s29  ;;  %p1329_p1 = scmp.lt.s32.totalorder %s1327_s16, %s1321_s29 }
 0x1ab   : > { %p1323_p12 = pnand %p1322_p11, %p1488_p5  ;;  %p1330_p2 = por %p1329_p1, %p1328_p0 }
 0x1ac   : > { %v625_v25 = vpop.permute.xlu1 %624 }
 0x1ad   : > { %v571_v28 = vpop.permute.xlu0 %570  ;;  %p1324_p13 = pneg %p1323_p12 }
 0x1af   : > { %p1331_p3 = pnand %p1330_p2, %p1324_p13 }
 0x1b1   : > { %v637_v27 = vpop.permute.xlu1 %636  ;;  %v630_v30 = vpop.permute.xlu0 %629 }
 0x1b5   : > { %v578_v29 = vpop.permute.xlu1 %577  ;;  %v512_v32 = vpop.permute.xlu0 %511 }
 0x1b6   : > { %v580_v47 = vsel %vm566_vm5, %v578_v29, %v576_v24  ;;  %v579_v63 = vsel %vm566_vm5, %v576_v24, %v578_v29 }
 0x1b7   : > { %v585_v54 = vmul.f32 %v583_v21, %v580_v47  ;;  %v586_v15 = vmul.f32 %v583_v21, %v579_v63 }
 0x1b9   : > { %v632_v31 = vpop.permute.xlu1 %631  ;;  %v516_v34 = vpop.permute.xlu0 %515 }
 0x1ba   : > { %v633_v2 = vsel %vm620_vm7, %v630_v30, %v632_v31  ;;  %v634_v7 = vsel %vm620_vm7, %v632_v31, %v630_v30 }
 0x1bb   : > { %v639_v18 = vmul.f32 %v637_v27, %v633_v2  ;;  %v640_v19 = vmul.f32 %v637_v27, %v634_v7  ;;  %v337_v7 = vld [vmem:[%s1725_s8 + $0x28] sm:$0xf] }
 0x1bd   : > { %v514_v33 = vpop.permute.xlu1 %513  ;;  %v1597_v40 = vpop.permute.xlu0 %536 }
 0x1be   : > { %v518_v11 = vsel %vm517_vm2, %v512_v32, %v514_v33  ;;  %v519_v20 = vsel %vm517_vm2, %v514_v33, %v516_v34 }
 0x1bf   : > { %v522_v30 = vadd.f32 %v518_v11, %v499_v10  ;;  %v523_v33 = vadd.f32 %v519_v20, %v500_v14  ;;  %v792_v10 = vld [vmem:[%s1722_s5] sm:$0xf]  ;;  %v1398_v11 = vmov 839922192  }
 0x1c1   : > { %v535_v36 = vpop.permute.xlu1 %534 }
 0x1c2   : > { %v541_v24 = vsel %vm540_vm3, %v535_v36, %v1597_v40 }
 0x1c3   : > { %v545_v23 = vadd.f32 %v541_v24, %v522_v30 }
 0x201   : > { %v561_v44 = vpop.permute.xlu0 %560 }
 0x203   : > { %v563_v41 = vpop.permute.xlu1 %562 }
 0x204   : > { %v568_v46 = vsel %vm566_vm5, %v563_v41, %v561_v44  ;;  %v567_v55 = vsel %vm566_vm5, %v561_v44, %v563_v41 }
 0x205   : > { %v573_v51 = vmul.f32 %v571_v28, %v568_v46  ;;  %v617_v57 = vpop.permute.xlu0 %616  ;;  %v574_v8 = vmul.f32 %v571_v28, %v567_v55 }
 0x207   : > { %v603_v45 = vpop.permute.xlu1 %602  ;;  %v587_v4 = vadd.f32 %v585_v54, %v573_v51  ;;  %v588_v56 = vadd.f32 %v586_v15, %v574_v8 }
 0x209   : > { %v646_v28 = vpop.permute.xlu0 %645 }
 0x20b   : > { %v605_v52 = vpop.permute.xlu1 %604 }
 0x20c   : > { %v607_v53 = vsel %vm566_vm5, %v605_v52, %v603_v45  ;;  %v606_v1 = vsel %vm566_vm5, %v603_v45, %v605_v52 }
 0x20d   : > { %v612_v59 = vmul.f32 %v610_v22, %v607_v53  ;;  %v613_v16 = vmul.f32 %v610_v22, %v606_v1  ;;  %v335_v1 = vld [vmem:[%s1725_s8 + $0x18] sm:$0xf] }
 0x20f   : > { %v619_v6 = vpop.permute.xlu1 %618  ;;  %v614_v12 = vadd.f32 %v612_v59, %v587_v4 }
 0x210   : > { %v621_v3 = vsel %vm620_vm7, %v617_v57, %v619_v6  ;;  %v622_v9 = vsel %vm620_vm7, %v619_v6, %v617_v57  ;;  %v336_v6 = vld [vmem:[%s1725_s8 + $0x20] sm:$0xff] }
 0x211   : > { %v627_v13 = vmul.f32 %v625_v25, %v621_v3  ;;  %v628_v17 = vmul.f32 %v625_v25, %v622_v9  ;;  %v668_v22 = vsel %vm666_vm8, %v614_v12, 0.0  ;;  %v615_v25 = vadd.f32 %v613_v16, %v588_v56 }
 0x212   : > { %v670_v41 = vadd.f32 %v668_v22, %v545_v23  ;;  %v883_v12 = vunpack.c.l.s4 %v1398_v11 }
 0x213   : > { %v644_v29 = vpop.permute.xlu1 %643  ;;  %v641_v35 = vadd.f32 %v639_v18, %v627_v13  ;;  %v642_v27 = vadd.f32 %v640_v19, %v628_v17 }
 0x214   : > { %v647_v31 = vsel %vm620_vm7, %v644_v29, %v646_v28  ;;  %v648_v32 = vsel %vm620_vm7, %v646_v28, %v644_v29  ;;  %v884_v13 = vunpack.c.0.s8 %v883_v12  ;;  %v1038_v12 = vld [vmem:[%s1724_s7] sm:$0xf] }
 0x215   : > { %v653_v58 = vmul.f32 %v1590_v26, %v647_v31  ;;  %v654_v21 = vmul.f32 %v1590_v26, %v648_v32  ;;  %v669_v26 = vsel %vm667_vm10, %v615_v25, 0.0 }
 0x216   : > { %v690_v45 = vpop.permute.xlu0 %689  ;;  %v1655_v15 = vsub.s32 %v884_v13, %v1595_v38 }
 0x217   : > { %v655_v34 = vadd.f32 %v653_v58, %v641_v35  ;;  %v539_v36 = vpop.permute.xlu1 %538  ;;  %v656_v37 = vadd.f32 %v654_v21, %v642_v27 }
 0x218   : > { %v542_v39 = vsel %vm540_vm3, %v1597_v40, %v539_v36 }
 0x219   : > { %v683_v42 = vsel %vm681_vm9, %v655_v34, 0.0  ;;  %v546_v43 = vadd.f32 %v542_v39, %v523_v33  ;;  %v684_v47 = vsel %vm682_vm11, %v656_v37, 0.0 }
 0x21a   : > { %v685_v44 = vadd.f32 %v683_v42, %v670_v41 }
 0x21b   : > { %v671_v46 = vadd.f32 %v669_v26, %v546_v43 }
 0x21c   : > { %v692_v48 = vadd.f32 %v690_v45, %v685_v44 }
 0x21d   : > { %v686_v49 = vadd.f32 %v684_v47, %v671_v46 }
 0x21e   : > { %v696_v50 = vrot.slane %v692_v48, 4 }
 0x21f   : > { %v693_v51 = vadd.f32 %v690_v45, %v686_v49 }
 0x220   : > { %v700_v52 = vmul.f32 %v696_v50, %v692_v48 }
 0x221   : > { %v697_v53 = vrot.slane %v693_v51, 4 }
 0x222   : > { %v702_v55 = vsel %vm342_vm0, %v700_v52, 0.0 }
 0x223   : > { %v701_v54 = vmul.f32 %v697_v53, %v693_v51 }
 0x225   : > { %v703_v57 = vsel %vm342_vm0, %v701_v54, 0.0 }
 0x226   : > { %v704_v40 = vadd.f32 %v703_v57, %v702_v55 }
 0x228   : > { %705 = vadd.xlane.f32.xlu1 %v704_v40 }
 0x2b1   : > { %v706_v59 = vpop.xlane.xlu1 %705 }
 0x2b2   : > { %v707_v60 = vmul.f32 0.00390625, %v706_v59 }
 0x2b4   : > { %1243 = vmatpush3.msk.msra.mxu1 %vm342_vm0, %v707_v60 }
 0x2b5   : > { %1245 = vmatmul.mubr.msk.f32.vlgmr.msra.gmra.mxu1 %vm401_vm1, %v708_v61 }
 0x2b6   : > { %1023 = vmatprep.mubr.f32.mxu1 %v1383_v0 }
 0x375   : > { %v781_v63 = vpop.f32.mrf.mxu1 }
 0x376   : > { %v782_v2 = vadd.f32 %v781_v63, %v334_v62 }
 0x377   : > { %v1246_v4 = vpop.f32.mrf.mxu1 }
 0x378   : > { %787 = vperm.xlu0 %1311, %v782_v2   ;;  %v891_v2 = vld [vmem:[%s1723_s6] sm:$0xff] }
 0x37c   : > { %880 = vperm.xlu0 %1311, %v335_v1  }
 0x380   : > { %947 = vperm.xlu0 %1311, %v336_v6  }
 0x384   : > { %1126 = vperm.xlu0 %1311, %v337_v7  }
 0x3f3   : > { %v788_v8 = vpop.permute.xlu0 %787 }
 0x3f4   : > { %v790_v3 = vmul.f32 %v788_v8, %v700_v52  ;;  %v791_v9 = vmul.f32 %v788_v8, %v701_v54 }
 0x3f6   : > { %1224 = vmatprep.subr.msk.mxu0 %vm342_vm0, %v791_v9 }
 0x3f7   : > { %1225 = vmatpush1.msk.msra.mxu0 %vm342_vm0, %v790_v3  ;;  %v881_v16 = vpop.permute.xlu0 %880 }
 0x3f8   : > { %1226 = vmatmul.mubr.msk.f32.vlgmr.msra.gmra.mxu0 %vm401_vm1, %v792_v10  ;;  %v888_v19 = vrot.slane %v881_v16, %v1655_v15 }
 0x3f9   : > { %1112 = vmatprep.mubr.f32.mxu0 %v1383_v0 }
 0x3fb   : > { %v948_v4 = vpop.permute.xlu0 %947 }
 0x4b8   : > { %v868_v14 = vpop.f32.mrf.mxu0 }
 0x4ba   : > { %v870_v17 = vpop.f32.mrf.mxu0 }
 0x4bb   : > { %v875_v18 = vcombine.low %v868_v14, %v870_v17  ;;  %v1127_v14 = vpop.permute.xlu0 %1126 }
 0x4bd   : > { %v877_v20 = vadd.f32 %v875_v18, %v1515_v5  ;;  %v1134_v18 = vrot.slane %v1127_v14, %v1655_v15 }
 0x4bf   : > { %v1659_v24 = vadd.f32 %v888_v19, %v877_v20 }
 0x4c1   : > { %v893_v28 = vcombine.high %v1659_v24, %v1659_v24  ;;  %v895_v0 = vsel %vm342_vm0, %v1659_v24, 0.0 }
 0x4c2   : > { %v896_v29 = vrot.slane %v895_v0, 4 }
 0x4c3   : > { %v902_v30 = vsel %vm342_vm0, %v893_v28, 0.0 }
 0x4c4   : > { %v897_v38 = vadd.f32 %v896_v29, %v895_v0  ;;  %v903_v56 = vrot.slane %v902_v30, 4 }
 0x4c6   : > { %v898_v31 = vrot.slane %v897_v38, 2  ;;  %v904_v32 = vadd.f32 %v903_v56, %v902_v30 }
 0x4c8   : > { %v899_v35 = vadd.f32 %v898_v31, %v897_v38  ;;  %v905_v58 = vrot.slane %v904_v32, 2 }
 0x4ca   : > { %v900_v21 = vrot.slane %v899_v35, 1  ;;  %v906_v22 = vadd.f32 %v905_v58, %v904_v32 }
 0x4cc   : > { %v901_v5 = vadd.f32 %v900_v21, %v899_v35  ;;  %v907_v23 = vrot.slane %v906_v22, 1 }
 0x4ce   : > { %v908_v25 = vadd.f32 %v907_v23, %v906_v22  ;;  %v909_v27 = vmul.f32 0.25, %v901_v5 }
 0x4d0   : > { %v910_v33 = vmul.f32 0.25, %v908_v25 }
 0x4d2   : > { %v913_v34 = vcombine.low %v909_v27, %v910_v33 }
 0x4d4   : > { %v915_v36 = vsub.f32 %v1659_v24, %v913_v34 }
 0x4d6   : > { %v916_v37 = vmul.f32 %v915_v36, %v915_v36 }
 0x4d8   : > { %v918_v41 = vcombine.high %v916_v37, %v916_v37  ;;  %v920_v39 = vsel %vm342_vm0, %v916_v37, 0.0 }
 0x4d9   : > { %v921_v42 = vrot.slane %v920_v39, 4 }
 0x4da   : > { %v927_v43 = vsel %vm342_vm0, %v918_v41, 0.0 }
 0x4db   : > { %v922_v44 = vadd.f32 %v921_v42, %v920_v39  ;;  %v928_v26 = vrot.slane %v927_v43, 4 }
 0x4dd   : > { %v923_v45 = vrot.slane %v922_v44, 2  ;;  %v929_v46 = vadd.f32 %v928_v26, %v927_v43 }
 0x4df   : > { %v924_v47 = vadd.f32 %v923_v45, %v922_v44  ;;  %v930_v48 = vrot.slane %v929_v46, 2 }
 0x4e1   : > { %v925_v49 = vrot.slane %v924_v47, 1  ;;  %v931_v50 = vadd.f32 %v930_v48, %v929_v46 }
 0x4e3   : > { %v926_v51 = vadd.f32 %v925_v49, %v924_v47  ;;  %v932_v52 = vrot.slane %v931_v50, 1 }
 0x4e5   : > { %v933_v53 = vadd.f32 %v932_v52, %v931_v50  ;;  %v934_v54 = vmul.f32 0.25, %v926_v51 }
 0x4e7   : > { %v935_v55 = vmul.f32 0.25, %v933_v53  ;;  %v936_v57 = vadd.f32 1e-06, %v934_v54 }
 0x4e9   : > { %v937_v40 = vadd.f32 1e-06, %v935_v55  ;;  %1317 = vrsqrt.f32 %v936_v57 }
 0x4eb   : > { %1319 = vrsqrt.f32 %v937_v40 }
 0x4f6   : > { %v1318_v59 = vpop.eup %1317 }
 0x4f8   : > { %v1320_v60 = vpop.eup %1319 }
 0x4f9   : > { %v942_v61 = vcombine.low %v1318_v59, %v1320_v60 }
 0x4fb   : > { %v944_v62 = vmul.f32 %v942_v61, %v915_v36 }
 0x4fd   : > { %v951_v63 = vcombine.high %v944_v62, %v944_v62 }
 0x4ff   : > { %1227 = vmatprep.subr.msk.mxu1 %vm342_vm0, %v951_v63 }
 0x500   : > { %1228 = vmatpush1.msk.msra.mxu1 %vm342_vm0, %v944_v62 }
 0x501   : > { %1229 = vmatmul.mubr.msk.f32.vlgmr.msra.gmra.mxu1 %vm401_vm1, %v891_v2 }
 0x5c1   : > { %v1025_v1 = vpop.f32.mrf.mxu1 }
 0x5c2   : > { %v1026_v6 = vadd.f32 %v1025_v1, %v948_v4 }
 0x5c3   : > { %v1027_v7 = vpop.f32.mrf.mxu1 }
 0x5c4   : > { %v1028_v8 = vadd.f32 %v1027_v7, %v948_v4  ;;  %v1032_v3 = vrot.slane %v1026_v6, 4 }
 0x5c6   : > { %v1033_v9 = vrot.slane %v1028_v8, 4  ;;  %v1036_v11 = vmul.f32 %v1032_v3, %v1026_v6 }
 0x5c8   : > { %v1037_v10 = vmul.f32 %v1033_v9, %v1028_v8 }
 0x5ca   : > { %1230 = vmatprep.subr.msk.mxu0 %vm342_vm0, %v1037_v10 }
 0x5cb   : > { %1231 = vmatpush1.msk.msra.mxu0 %vm342_vm0, %v1036_v11 }
 0x5cc   : > { %1232 = vmatmul.mubr.msk.f32.vlgmr.msra.gmra.mxu0 %vm401_vm1, %v1038_v12 }
 0x68c   : > { %v1114_v13 = vpop.f32.mrf.mxu0 }
 0x68e   : > { %v1116_v16 = vpop.f32.mrf.mxu0 }
 0x68f   : > { %v1121_v17 = vcombine.low %v1114_v13, %v1116_v16 }
 0x691   : > { %v1123_v19 = vadd.f32 %v1121_v17, %v1659_v24 }
 0x693   : > { %v1136_v20 = vadd.f32 %v1134_v18, %v1123_v19 }
 0x695   : > { %1137 = vst [vmem:[%s325_s23] sm:$0xff] %v1136_v20 }
 0x696   : > { %1334 = shalt.err (!%p1331_p3)
}
 0x697   : > { %s1335_s21 = scalar_lea.hbm %s1151_s27, 128  ;;  %s1339_s23 = scalar_lea.hbm %s1726_s9, 256 }
 0x698   : > { %p1336_p4 = scmp.ne.s32.totalorder %s1151_s27, %s1335_s21  ;;  %p1340_p9 = scmp.lt.s32.totalorder %s1151_s27, %s1726_s9 }
 0x699   : > { %p1341_p10 = scmp.lt.s32.totalorder %s1339_s23, %s1335_s21 }
 0x69a   : > { %p1337_p7 = pnand %p1336_p4, %p1488_p5 }
 0x69b   : > { %p1342_p11 = por %p1341_p10, %p1340_p9 }
 0x69c   : > { %p1338_p8 = pneg %p1337_p7 }
 0x69e   : > { %p1343_p12 = pnand %p1342_p11, %p1338_p8 }
 0x6a0   : > { %1346 = shalt.err (!%p1343_p12)
}
 0x6a1   : > { %1247 = dma.vmem_to_hbm [thread:$0]  (%p1488_p5), %s1154_s24, 128, %s1151_s27, %s1139_s28  }
 0x6a2 PF: > { %p1253_p13 = scmp.ge.s32.totalorder %s1381_s12, 2  ;;  %s1165_s29 = sand.u32 1, %s1369_s30  }
 0x6a3   : > { %s1166_s13 = scalar_lea.sflag [#allocation4], %s1165_s29 }
 0x6a4   : > { %p1250_p0 = pnand %p1253_p13, %p1492_p6 }
 0x6a6   : > { %p1251_p1 = pneg %p1250_p0 }
 0x6a8   : > { %1364 = dma.done.wait (%p1251_p1), %s1166_s13, 128  }
 0x6a9   : > { %1366 = vsyncadd (%p1251_p1), %s1166_s13, 4294967168  ;;  %p19_p2 = scmp.ge.s32.totalorder %s1475_s15, 4   ;;  %s1729_s30 = smov %s1373_s10 }
 0x6aa   : > { %s1730_s10 = smov %s1377_s11  ;;  %s1731_s11 = smov %s1486_s18 }
 0x6ab   : > { %s1732_s12 = smov %s1475_s15  ;;  %21 = sbr.rel (!%p19_p2) target bundleno = 3 (0x3), region = 91 }
 0x6b0   :  { %1171 = vsyncpa [#allocation4], 1 }
 0x6b1   :  { %1173 = vsyncpa [#allocation4 + $0x1], 1 }

</bundles_post_ra>
